<compile_context>
chip_gen: v5e
topology: v5e:2x2
jax: 0.10.0
libtpu: 0.0.40
codegen_flags: <defaults>
</compile_context>

<pallas_src>
import functools

import jax
import jax.numpy as jnp
from jax.experimental import pallas as pl
from jax.experimental.pallas import tpu as pltpu

_LANE = 128       # lane (last-dim) granularity
_BF16_ROWS = 16   # bf16 packs 2 rows per sublane -> batch granularity


def _round_up(n, m):
    return ((n + m - 1) // m) * m


def _pad2(a, rows, cols):
    return jnp.pad(a, ((0, rows - a.shape[0]), (0, cols - a.shape[1])))


# ----------------------------- fused kernel --------------------------------


def _make_fused_mlp_kernel(num_hidden):
    """Kernel over refs: (x, w1, b1, ..., wH, bH, w_out, b_out, o)."""

    def kernel(*refs):
        x_ref = refs[0]
        o_ref = refs[-1]
        h = x_ref[...]                      # bf16 batch tile
        idx = 1
        for _ in range(num_hidden):
            w_ref, b_ref = refs[idx], refs[idx + 1]
            idx += 2
            # bf16 x bf16 -> f32 accumulation on the MXU.
            z = jnp.dot(h, w_ref[...], preferred_element_type=jnp.float32) + b_ref[...]
            # ReLU (BN scale already folded into W/b; shift into next bias).
            # Bias+ReLU are VPU ops that co-issue with MXU slots -> free filler.
            h = jnp.maximum(z, 0.0).astype(jnp.bfloat16)
        w_ref, b_ref = refs[idx], refs[idx + 1]
        o_ref[...] = (
            jnp.dot(h, w_ref[...], preferred_element_type=jnp.float32) + b_ref[...]
        ).astype(o_ref.dtype)

    return kernel


def fused_mlp(x, layers, *, out_dim, true_dims, block_batch=256):
    """Fused MLP forward.

    layers:     tuple of (W_bf16, b_f32) pairs (BN-folded, lane-padded).
    true_dims:  tuple of (din, dout) per layer -- UNPADDED dims, for CostEstimate.
    block_batch: batch tile (multiple of 16). Production default 256 to fill the
                 MXU M dim on v6e/v7x; smaller values only for tiny-shape tests.
    Returns (B, out_dim) float32.
    """
    assert block_batch % _BF16_ROWS == 0
    B, Din = x.shape
    Din_p = layers[0][0].shape[0]
    Dout_p = layers[-1][0].shape[1]
    num_hidden = len(layers) - 1

    # Pad batch to a multiple of 16 (bf16 sublane packing), then to the tile.
    Bp16 = _round_up(B, _BF16_ROWS)
    tb = min(block_batch, Bp16)
    Bp = _round_up(Bp16, tb)
    grid = (Bp // tb,)

    xp = jnp.pad(x, ((0, Bp - B), (0, Din_p - Din))).astype(jnp.bfloat16)

    flat_args = [xp]
    # x / out tiles move along the batch grid axis; weights & biases are pinned
    # (constant block index) so they stay resident in VMEM across all tiles.
    in_specs = [pl.BlockSpec((tb, Din_p), lambda i: (i, 0))]
    for w, b in layers:
        flat_args += [w, b]
        in_specs += [
            pl.BlockSpec(w.shape, lambda i: (0, 0)),
            pl.BlockSpec(b.shape, lambda i: (0, 0)),
        ]
    out_spec = pl.BlockSpec((tb, Dout_p), lambda i: (i, 0))

    # Cost estimate from TRUE (unpadded) dims and actual operand dtypes.
    flops = 0
    bytes_accessed = B * Din * 2 + B * out_dim * 4           # bf16 in, f32 out
    for din, dout in true_dims:
        flops += 2 * B * din * dout
        bytes_accessed += din * dout * 2 + dout * 4           # bf16 W, f32 b

    # Explicit VMEM budget: resident weights + double-buffered x/out tiles +
    # activation headroom, 2x margin, capped at v7x physical (64 MiB).
    weight_bytes = sum(w.size * w.dtype.itemsize + b.size * b.dtype.itemsize
                       for w, b in layers)
    max_dim_p = max([Din_p] + [w.shape[1] for w, _ in layers])
    io_bytes = 2 * (tb * Din_p * 2 + tb * Dout_p * 4)
    act_bytes = 4 * tb * max_dim_p * 4
    needed = weight_bytes + io_bytes + act_bytes
    vmem_limit = int(min(64 * 1024 * 1024, max(2 * needed, 16 * 1024 * 1024)))
    # TODO(synk): once resident weight bytes approach ~24-32 MiB, switch to
    #             per-layer weight streaming (emit_pipeline / manual double-buffer).

    out = pl.pallas_call(
        _make_fused_mlp_kernel(num_hidden),
        out_shape=jax.ShapeDtypeStruct((Bp, Dout_p), jnp.float32),
        grid=grid,
        in_specs=in_specs,
        out_specs=out_spec,
        compiler_params=pltpu.CompilerParams(
            dimension_semantics=("parallel",),      # v7x: split batch tiles across 2 TCs
            vmem_limit_bytes=vmem_limit,
        ),
        cost_estimate=pl.CostEstimate(
            flops=int(flops), transcendentals=0, bytes_accessed=int(bytes_accessed)
        ),
    )(*flat_args)
    return out[:B, :out_dim]


# ----------------------------- model setup ---------------------------------


def init_complexnet_params(key, input_dim, hidden_dims, output_dim):
    """Deterministic PyTorch-style init: U(-1/sqrt(fan_in), 1/sqrt(fan_in)).

    Hidden layers also carry eval-mode BatchNorm1d params
    (gamma=1, beta=0, running_mean=0, running_var=1).
    """
    params = []
    prev = input_dim
    dims = list(hidden_dims) + [output_dim]
    for li, dim in enumerate(dims):
        key, kw, kb = jax.random.split(key, 3)
        bound = 1.0 / jnp.sqrt(prev)
        # stored as (in, out) == transpose of PyTorch's (out, in)
        w = jax.random.uniform(kw, (prev, dim), jnp.float32, -bound, bound)
        b = jax.random.uniform(kb, (1, dim), jnp.float32, -bound, bound)
        layer = {"w": w, "b": b}
        if li < len(hidden_dims):
            layer["gamma"] = jnp.ones((1, dim), jnp.float32)
            layer["beta"] = jnp.zeros((1, dim), jnp.float32)
            layer["mean"] = jnp.zeros((1, dim), jnp.float32)
            layer["var"] = jnp.ones((1, dim), jnp.float32)
        params.append(layer)
        prev = dim
    return params


def fold_bn_into_linear(params, eps=1e-5):
    """Fold eval-mode BN into Linear weights.

    For each hidden layer:  relu(xW+b)*scale + shift
       -> scale > 0 commutes with ReLU:  relu(x(W*scale) + b*scale) + shift
       -> '+ shift' is folded into the NEXT layer's bias (b_next += shift @ W_next).
    Requires scale = gamma/sqrt(var+eps) > 0 per channel; guarded below.
    Returns a list of (W, b) pairs.
    """
    folded = []
    carry_shift = None
    for layer in params:
        w, b = layer["w"], layer["b"]
        if carry_shift is not None:
            b = b + carry_shift @ w
        if "gamma" in layer:
            scale = layer["gamma"] / jnp.sqrt(layer["var"] + eps)   # (1, dim)
            if not bool(jnp.all(scale > 0)):
                # TODO(synk): for trained models with gamma<=0, keep BN unfused
                #             (or fold only positive channels) instead of this fold.
                raise ValueError("BN-through-ReLU fold requires positive per-channel scale")
            shift = layer["beta"] - layer["mean"] * scale
            w = w * scale
            b = b * scale
            carry_shift = shift
        else:
            carry_shift = None
        folded.append((w, b))
    return folded


def pad_params_lane_dense(folded):
    """Zero-pad (W, b) so feature dims are multiples of 128; W stored as bf16."""
    padded = []
    for w, b in folded:
        din, dout = w.shape
        din_p = _round_up(din, _LANE)
        dout_p = _round_up(dout, _LANE)
        padded.append((
            _pad2(w, din_p, dout_p).astype(jnp.bfloat16),   # MXU operand dtype
            _pad2(b, 1, dout_p).astype(jnp.float32),         # bias added in f32
        ))
    return tuple(padded)


def reference_forward(x, params, eps=1e-5):
    """Pure-JAX eval-mode reference (un-folded, un-padded, full f32)."""
    h = x
    for layer in params[:-1]:
        h = jnp.maximum(h @ layer["w"] + layer["b"], 0.0)
        scale = layer["gamma"] / jnp.sqrt(layer["var"] + eps)
        h = (h - layer["mean"]) * scale + layer["beta"]
        # Dropout(eval) == identity
    last = params[-1]
    return h @ last["w"] + last["b"]


# ----------------------------- main -----------------------------------------


if __name__ == "__main__":
    input_dim = 32
    hidden_dims = [64, 128]
    output_dim = 16
    batch = 40   # not a multiple of the batch tile -> exercises padding + multi-tile grid

    key = jax.random.PRNGKey(0)
    key, kx = jax.random.split(key)
    x = jax.random.normal(kx, (batch, input_dim), jnp.float32)

    params = init_complexnet_params(key, input_dim, hidden_dims, output_dim)
    folded = fold_bn_into_linear(params)
    true_dims = tuple((int(w.shape[0]), int(w.shape[1])) for w, _ in folded)
    padded = pad_params_lane_dense(folded)

    # block_batch=16 only to exercise the multi-tile grid at these tiny test shapes;
    # production default is 256 (fills the MXU M dimension on v6e/v7x).
    fwd = jax.jit(functools.partial(
        fused_mlp, out_dim=output_dim, true_dims=true_dims, block_batch=16))
    out = jax.block_until_ready(fwd(x, padded))

    ref = reference_forward(x, params)
    assert out.shape == (batch, output_dim), out.shape
    max_err = float(jnp.max(jnp.abs(out - ref)))
    # bf16 operands (f32 accumulation) -> looser tolerance than pure-f32.
    assert jnp.allclose(out, ref, atol=2e-2, rtol=2e-2), f"mismatch vs reference (max abs err {max_err})"

    print("KERNEL_OK")
</pallas_src>

<mosaic_0001>
module attributes {stable_mosaic.version = 11 : i64} {
  func.func @kernel(%arg0: i32, %arg1: memref<16x128xbf16, #tpu.memory_space<vmem>>, %arg2: memref<128x128xbf16, #tpu.memory_space<vmem>>, %arg3: memref<1x128xf32, #tpu.memory_space<vmem>>, %arg4: memref<128x128xbf16, #tpu.memory_space<vmem>>, %arg5: memref<1x128xf32, #tpu.memory_space<vmem>>, %arg6: memref<128x128xbf16, #tpu.memory_space<vmem>>, %arg7: memref<1x128xf32, #tpu.memory_space<vmem>>, %arg8: memref<16x128xf32, #tpu.memory_space<vmem>>) attributes {dimension_semantics = [#tpu.dimension_semantics<parallel>], iteration_bounds = array<i64: 3>, scalar_prefetch = 0 : i64, scratch_operands = 0 : i64, tpu.core_type = #tpu.core_type<tc>, window_params = [{transform_indices = @transform_0, window_bounds = array<i64: 16, 128>}, {pipeline_mode = #tpu.pipeline_mode<synchronous>, transform_indices = @transform_1, window_bounds = array<i64: 128, 128>}, {pipeline_mode = #tpu.pipeline_mode<synchronous>, transform_indices = @transform_2, window_bounds = array<i64: 1, 128>}, {pipeline_mode = #tpu.pipeline_mode<synchronous>, transform_indices = @transform_3, window_bounds = array<i64: 128, 128>}, {pipeline_mode = #tpu.pipeline_mode<synchronous>, transform_indices = @transform_4, window_bounds = array<i64: 1, 128>}, {pipeline_mode = #tpu.pipeline_mode<synchronous>, transform_indices = @transform_5, window_bounds = array<i64: 128, 128>}, {pipeline_mode = #tpu.pipeline_mode<synchronous>, transform_indices = @transform_6, window_bounds = array<i64: 1, 128>}, {transform_indices = @transform_7, window_bounds = array<i64: 16, 128>}]} {
    %c0 = arith.constant 0 : index
    %c0_0 = arith.constant 0 : index
    %0 = vector.load %arg1[%c0, %c0_0] : memref<16x128xbf16, #tpu.memory_space<vmem>>, vector<16x128xbf16>
    %c0_1 = arith.constant 0 : index
    %c0_2 = arith.constant 0 : index
    %1 = vector.load %arg2[%c0_1, %c0_2] : memref<128x128xbf16, #tpu.memory_space<vmem>>, vector<128x128xbf16>
    %cst = arith.constant dense<0.000000e+00> : vector<16x128xf32>
    %2 = tpu.matmul %0, %1, %cst {dimension_numbers = #tpu.dot_dimension_numbers<[1], [0], [0], [1], [0, 0, 1, 1], [], []>} : vector<16x128xbf16>, vector<128x128xbf16>, vector<16x128xf32> -> vector<16x128xf32>
    %c0_3 = arith.constant 0 : index
    %c0_4 = arith.constant 0 : index
    %3 = vector.load %arg3[%c0_3, %c0_4] : memref<1x128xf32, #tpu.memory_space<vmem>>, vector<1x128xf32>
    %4 = vector.broadcast %3 : vector<1x128xf32> to vector<16x128xf32>
    %5 = arith.addf %2, %4 : vector<16x128xf32>
    %cst_5 = arith.constant 0.000000e+00 : f32
    %6 = vector.broadcast %cst_5 : f32 to vector<16x128xf32>
    %7 = arith.maximumf %5, %6 : vector<16x128xf32>
    %8 = arith.truncf %7 : vector<16x128xf32> to vector<16x128xbf16>
    %c0_6 = arith.constant 0 : index
    %c0_7 = arith.constant 0 : index
    %9 = vector.load %arg4[%c0_6, %c0_7] : memref<128x128xbf16, #tpu.memory_space<vmem>>, vector<128x128xbf16>
    %cst_8 = arith.constant dense<0.000000e+00> : vector<16x128xf32>
    %10 = tpu.matmul %8, %9, %cst_8 {dimension_numbers = #tpu.dot_dimension_numbers<[1], [0], [0], [1], [0, 0, 1, 1], [], []>} : vector<16x128xbf16>, vector<128x128xbf16>, vector<16x128xf32> -> vector<16x128xf32>
    %c0_9 = arith.constant 0 : index
    %c0_10 = arith.constant 0 : index
    %11 = vector.load %arg5[%c0_9, %c0_10] : memref<1x128xf32, #tpu.memory_space<vmem>>, vector<1x128xf32>
    %12 = vector.broadcast %11 : vector<1x128xf32> to vector<16x128xf32>
    %13 = arith.addf %10, %12 : vector<16x128xf32>
    %cst_11 = arith.constant 0.000000e+00 : f32
    %14 = vector.broadcast %cst_11 : f32 to vector<16x128xf32>
    %15 = arith.maximumf %13, %14 : vector<16x128xf32>
    %16 = arith.truncf %15 : vector<16x128xf32> to vector<16x128xbf16>
    %c0_12 = arith.constant 0 : index
    %c0_13 = arith.constant 0 : index
    %17 = vector.load %arg6[%c0_12, %c0_13] : memref<128x128xbf16, #tpu.memory_space<vmem>>, vector<128x128xbf16>
    %cst_14 = arith.constant dense<0.000000e+00> : vector<16x128xf32>
    %18 = tpu.matmul %16, %17, %cst_14 {dimension_numbers = #tpu.dot_dimension_numbers<[1], [0], [0], [1], [0, 0, 1, 1], [], []>} : vector<16x128xbf16>, vector<128x128xbf16>, vector<16x128xf32> -> vector<16x128xf32>
    %c0_15 = arith.constant 0 : index
    %c0_16 = arith.constant 0 : index
    %19 = vector.load %arg7[%c0_15, %c0_16] : memref<1x128xf32, #tpu.memory_space<vmem>>, vector<1x128xf32>
    %20 = vector.broadcast %19 : vector<1x128xf32> to vector<16x128xf32>
    %21 = arith.addf %18, %20 : vector<16x128xf32>
    %c0_17 = arith.constant 0 : index
    %c0_18 = arith.constant 0 : index
    %22 = vector.load %arg8[%c0_17, %c0_18] : memref<16x128xf32, #tpu.memory_space<vmem>>, vector<16x128xf32>
    tpu.vector_store %arg8[%c0_17, %c0_18], %21 {strides = array<i32>} : memref<16x128xf32, #tpu.memory_space<vmem>>, vector<16x128xf32>,
    return
  }
  func.func @transform_0(%arg0: i32) -> (i32, i32) {
    %c0_i32 = arith.constant 0 : i32
    %c0_i32_0 = arith.constant 0 : i32
    return %arg0, %c0_i32 : i32, i32
  }
  func.func @transform_1(%arg0: i32) -> (i32, i32) {
    %c0_i32 = arith.constant 0 : i32
    %c0_i32_0 = arith.constant 0 : i32
    %c0_i32_1 = arith.constant 0 : i32
    return %c0_i32, %c0_i32_0 : i32, i32
  }
  func.func @transform_2(%arg0: i32) -> (i32, i32) {
    %c0_i32 = arith.constant 0 : i32
    %c0_i32_0 = arith.constant 0 : i32
    %c0_i32_1 = arith.constant 0 : i32
    return %c0_i32, %c0_i32_0 : i32, i32
  }
  func.func @transform_3(%arg0: i32) -> (i32, i32) {
    %c0_i32 = arith.constant 0 : i32
    %c0_i32_0 = arith.constant 0 : i32
    %c0_i32_1 = arith.constant 0 : i32
    return %c0_i32, %c0_i32_0 : i32, i32
  }
  func.func @transform_4(%arg0: i32) -> (i32, i32) {
    %c0_i32 = arith.constant 0 : i32
    %c0_i32_0 = arith.constant 0 : i32
    %c0_i32_1 = arith.constant 0 : i32
    return %c0_i32, %c0_i32_0 : i32, i32
  }
  func.func @transform_5(%arg0: i32) -> (i32, i32) {
    %c0_i32 = arith.constant 0 : i32
    %c0_i32_0 = arith.constant 0 : i32
    %c0_i32_1 = arith.constant 0 : i32
    return %c0_i32, %c0_i32_0 : i32, i32
  }
  func.func @transform_6(%arg0: i32) -> (i32, i32) {
    %c0_i32 = arith.constant 0 : i32
    %c0_i32_0 = arith.constant 0 : i32
    %c0_i32_1 = arith.constant 0 : i32
    return %c0_i32, %c0_i32_0 : i32, i32
  }
  func.func @transform_7(%arg0: i32) -> (i32, i32) {
    %c0_i32 = arith.constant 0 : i32
    %c0_i32_0 = arith.constant 0 : i32
    return %arg0, %c0_i32 : i32, i32
  }
}

</mosaic_0001>

<bundles_post_ra>
// kernel: fused_mlp.1
= control target key start
LH: loop header
LB: loop body
LE: loop exit
PB: predicated region body
PF: predicated region fallthrough
CT: control target
= control target key end

     0   :  { %12 = vsyncpa [#allocation3], 0  ;;  %s876_s24 = smov 0   ;;  %s957_s0 = inlined_call_operand.vmem [shape: bf16[48,128], index: 0, kind: input, shape index: {}]   ;;  %s958_s1 = inlined_call_operand.vmem [shape: bf16[128,128], index: 1, kind: input, shape index: {}]   ;;  %s959_s2 = inlined_call_operand.vmem [shape: f32[1,128], index: 2, kind: input, shape index: {}]   ;;  %s960_s3 = inlined_call_operand.vmem [shape: bf16[128,128], index: 3, kind: input, shape index: {}]   ;;  %s961_s4 = inlined_call_operand.vmem [shape: f32[1,128], index: 4, kind: input, shape index: {}]   ;;  %s962_s5 = inlined_call_operand.hbm [shape: bf16[128,128], index: 5, kind: input, shape index: {}]   ;;  %s963_s6 = inlined_call_operand.vmem [shape: f32[1,128], index: 6, kind: input, shape index: {}]   ;;  %s964_s7 = inlined_call_operand.vmem [shape: f32[48,128], index: 7, kind: output, shape index: {}]  }
   0x1 LB: > { %s224_s27 = sshll.u32 %s962_s5, 4  ;;  %s629_s28 = sadd.s32 4294967295, %s831_s24   ;;  %s831_s24 = sphi %s876_s24, %s18_s24   ;;  %s225_s27 = int_to_ptr.hbm [resolvable:$true] %s224_s27 }
   0x2   : > { %p631_p0 = scmp.ge.s32.totalorder %s831_s24, 1  ;;  %p201_p1 = scmp.lt.s32.totalorder %s831_s24, 4 }
   0x3   : > { %p775_p2 = scmp.eq.s32.totalorder %s629_s28, 0  ;;  %s833_s29 = smov [#allocation2]  }
   0x4   : > { %p202_p3 = pnand %p631_p0, %p201_p1  ;;  %s226_s30 = sshll.u32 %s833_s29, 4  ;;  %s227_s30 = int_to_ptr.vmem [resolvable:$true] %s226_s30 }
   0x5   : > { %s834_s8 = smov 64   ;;  %s835_s9 = smov 4  }
   0x6   : > { %p771_p4 = pneg %p202_p3  ;;  %254 = sbr.rel (%p202_p3) target bundleno = 467 (0x1d3), region = 48 }
   0x8   : > { %p772_p5 = pnand %p775_p2, %p771_p4 }
   0xa   : > { %774 = dma.hbm_to_vmem [thread:$0]  (!%p772_p5), %s225_s27, 1024, %s227_s30, [#allocation3], %s834_s8, %s834_s8, %s835_s9  }
   0xb   : > { %826 = dma.done.wait (%p775_p2), [#allocation3], 1024  }
   0xc   : > { %828 = vsyncadd (%p775_p2), [#allocation3], 4294966272  ;;  %v750_v0 = vld [vmem:[%s958_s1 + $0x38] sm:$0xff]  ;;  %v749_v1 = vld [vmem:[%s958_s1 + $0x30] sm:$0xff]  ;;  %s636_s25 = sshll.u32 %s629_s28, 1 }
   0xd   : > { %375 = vmatpush.bf16.msra.mxu0 %v750_v0  ;;  %v758_v2 = vld [vmem:[%s960_s3 + $0x38] sm:$0xff]  ;;  %v757_v3 = vld [vmem:[%s960_s3 + $0x30] sm:$0xff]  ;;  %v748_v4 = vld [vmem:[%s958_s1 + $0x28] sm:$0xff]  ;;  %p288_p6 = scmp.lt.s32.totalorder %s636_s25, 5 }
   0xe   : > { %460 = vmatpush.bf16.msra.mxu1 %v758_v2  ;;  %v756_v5 = vld [vmem:[%s960_s3 + $0x28] sm:$0xff]  ;;  %v747_v6 = vld [vmem:[%s958_s1 + $0x20] sm:$0xff]  ;;  %v746_v8 = vld [vmem:[%s958_s1 + $0x18] sm:$0xff] }
   0xf   : > { %v755_v7 = vld [vmem:[%s960_s3 + $0x20] sm:$0xff]  ;;  %v745_v9 = vld [vmem:[%s958_s1 + $0x10] sm:$0xff]  ;;  %s966_s25 = smov (!%p288_p6, %s636_s25), 5  ;;  %v744_v10 = vld [vmem:[%s958_s1 + $0x8] sm:$0xff] }
  0x10   : > { %s637_s11 = sshll.u32 %s966_s25, 2  ;;  %v743_v11 = vld [vmem:[%s958_s1] sm:$0xff]  ;;  %v754_v13 = vld [vmem:[%s960_s3 + $0x18] sm:$0xff]  ;;  %v753_v14 = vld [vmem:[%s960_s3 + $0x10] sm:$0xff]  ;;  %s639_s9 = sshll.u32 %s966_s25, 3 }
  0x11   : > { %376 = vmatpush.bf16.msra.mxu0 %v749_v1  ;;  %s291_s16 = scalar_lea.vmem %s957_s0, %s637_s11  ;;  %v752_v15 = vld [vmem:[%s960_s3 + $0x8] sm:$0xff]  ;;  %v751_v16 = vld [vmem:[%s960_s3] sm:$0xff]  ;;  %v766_v17 = vld [vmem:[#allocation2 + $0x38] sm:$0xff]  ;;  %s297_s13 = scalar_lea.vmem %s964_s7, %s639_s9 }
  0x12   : > { %461 = vmatpush.bf16.msra.mxu1 %v757_v3  ;;  %v742_v12 = vld [vmem:[%s291_s16] sm:$0xff]  ;;  %545 = vmatpush.bf16.msra.mxu2 %v766_v17  ;;  %v765_v18 = vld [vmem:[#allocation2 + $0x30] sm:$0xff]  ;;  %v764_v19 = vld [vmem:[#allocation2 + $0x28] sm:$0xff] }
  0x13   : > { %v763_v20 = vld [vmem:[#allocation2 + $0x20] sm:$0xff]  ;;  %v762_v29 = vld [vmem:[#allocation2 + $0x18] sm:$0xff]  ;;  %v761_v30 = vld [vmem:[#allocation2 + $0x10] sm:$0xff] }
  0x14   : > { %v788_v22 = vld [vmem:[%s959_s2] ss:$0 sm:$0xff]  ;;  %v760_v31 = vld [vmem:[#allocation2 + $0x8] sm:$0xff] }
  0x15   : > { %377 = vmatpush.bf16.msra.mxu0 %v748_v4  ;;  %v759_v32 = vld [vmem:[#allocation2] sm:$0xff] }
  0x16   : > { %462 = vmatpush.bf16.msra.mxu1 %v756_v5  ;;  %546 = vmatpush.bf16.msra.mxu2 %v765_v18  ;;  %v789_v34 = vld [vmem:[%s961_s4] ss:$0 sm:$0xff] }
  0x17   : > { %v790_v41 = vld [vmem:[%s963_s6] ss:$0 sm:$0xff] }
  0x19   : > { %378 = vmatpush.bf16.msra.mxu0 %v747_v6 }
  0x1a   : > { %463 = vmatpush.bf16.msra.mxu1 %v755_v7  ;;  %547 = vmatpush.bf16.msra.mxu2 %v764_v19 }
  0x1d   : > { %379 = vmatpush.bf16.msra.mxu0 %v746_v8 }
  0x1e   : > { %464 = vmatpush.bf16.msra.mxu1 %v754_v13  ;;  %548 = vmatpush.bf16.msra.mxu2 %v763_v20 }
  0x21   : > { %380 = vmatpush.bf16.msra.mxu0 %v745_v9 }
  0x22   : > { %465 = vmatpush.bf16.msra.mxu1 %v753_v14  ;;  %549 = vmatpush.bf16.msra.mxu2 %v762_v29 }
  0x25   : > { %381 = vmatpush.bf16.msra.mxu0 %v744_v10 }
  0x26   : > { %466 = vmatpush.bf16.msra.mxu1 %v752_v15  ;;  %550 = vmatpush.bf16.msra.mxu2 %v761_v30 }
  0x29   : > { %382 = vmatpush.bf16.msra.mxu0 %v743_v11 }
  0x2a   : > { %467 = vmatpush.bf16.msra.mxu1 %v751_v16  ;;  %551 = vmatpush.bf16.msra.mxu2 %v760_v31 }
  0x2c   : > { %383 = vmatmul.bf16.vlgmr.msra.gmra.mxu0 %v742_v12 }
  0x2e   : > { %552 = vmatpush.bf16.msra.mxu2 %v759_v32 }
  0xa9   : > { %v384_v21 = vpop.f32.mrf.mxu0 }
  0xaa   : > { %v385_v23 = vadd.f32 %v788_v22, %v384_v21 }
  0xac   : > { %v389_v26 = vmax.f32 %v385_v23, 0.0 }
  0xb1   : > { %v386_v24 = vpop.f32.mrf.mxu0 }
  0xb2   : > { %v387_v25 = vadd.f32 %v788_v22, %v386_v24 }
  0xb4   : > { %v390_v27 = vmax.f32 %v387_v25, 0.0 }
  0xb6   : > { %v391_v28 = vpack.c.bf16 %v390_v27, %v389_v26 }
  0xb8   : > { %468 = vmatmul.bf16.vlgmr.msra.gmra.mxu1 %v391_v28 }
 0x135   : > { %v469_v33 = vpop.f32.mrf.mxu1 }
 0x136   : > { %v470_v35 = vadd.f32 %v789_v34, %v469_v33 }
 0x138   : > { %v474_v38 = vmax.f32 %v470_v35, 0.0 }
 0x13d   : > { %v471_v36 = vpop.f32.mrf.mxu1 }
 0x13e   : > { %v472_v37 = vadd.f32 %v789_v34, %v471_v36 }
 0x140   : > { %v475_v39 = vmax.f32 %v472_v37, 0.0 }
 0x142   : > { %v476_v40 = vpack.c.bf16 %v475_v39, %v474_v38 }
 0x144   : > { %553 = vmatmul.bf16.vlgmr.msra.gmra.mxu2 %v476_v40 }
 0x1c7   : > { %v554_v42 = vpop.f32.mrf.mxu2 }
 0x1c8   : > { %v555_v43 = vadd.f32 %v790_v41, %v554_v42 }
 0x1ca   : > { %559 = vst [vmem:[%s297_s13] sm:$0xff] %v555_v43 }
 0x1cf   : > { %v556_v44 = vpop.f32.mrf.mxu2 }
 0x1d0   : > { %v557_v45 = vadd.f32 %v790_v41, %v556_v44 }
 0x1d2   : > { %560 = vst [vmem:[%s297_s13 + $0x8] sm:$0xff] %v557_v45 }
 0x1d3 PF: > { %s18_s24 = sadd.s32 1, %s831_s24  }
 0x1d4   : > { %p15_p7 = scmp.ge.s32.totalorder %s18_s24, 5  }
 0x1d6   :  { %17 = sbr.rel (!%p15_p7) target bundleno = 1 (0x1), region = 83 }
 0x1db   :  { %583 = vsyncpa [#allocation3], 1 }
 0x1dc   :  { %585 = vsyncpa [#allocation3 + $0x1], 1 }

</bundles_post_ra>
